<compile_context>
chip_gen: v6e
topology: v6e:2x2x1
jax: 0.10.0
libtpu: 0.0.40
codegen_flags: <defaults>
</compile_context>

<pallas_src>
import math

import jax
import jax.numpy as jnp
from jax.experimental import pallas as pl
from jax.experimental.pallas import tpu as pltpu

LANE = 128             # TPU vreg lane width -> lane-dense stores
SUBLANE = 8            # f32 sublane packing
MAX_BLOCK_ROWS = 1024  # 1024 x 128 x 4 B = 512 KiB per output block

# lowbias32 hash constants (32-bit, wrap-around arithmetic).
_GOLDEN = 0x9E3779B9
_M1 = 0x7FEB352D
_M2 = 0x846CA68B


def _round_up(a, b):
    return (a + b - 1) // b * b


# ---------------------------- Pallas kernel ----------------------------

def _bernoulli_mask_kernel(seed_ref, keep_ref, o_ref):
    """o[i, j] = 1.0 with prob keep_ref[0], else 0.0, i.i.d. per element."""
    nrows, nlanes = o_ref.shape

    # Global linear element index of every slot in this block (non-negative).
    row = jax.lax.broadcasted_iota(jnp.int32, (nrows, nlanes), 0)
    lane = jax.lax.broadcasted_iota(jnp.int32, (nrows, nlanes), 1)
    base = pl.program_id(0) * nrows
    idx = (base + row) * nlanes + lane

    # Stateless counter-based hash keyed by (seed, idx): same output no matter
    # how the grid is partitioned.
    h = idx.astype(jnp.uint32) + seed_ref[0].astype(jnp.uint32) * jnp.uint32(_GOLDEN)
    h = h ^ (h >> jnp.uint32(16))
    h = h * jnp.uint32(_M1)
    h = h ^ (h >> jnp.uint32(15))
    h = h * jnp.uint32(_M2)
    h = h ^ (h >> jnp.uint32(16))

    # Top 24 bits -> uniform in [0, 1) (exactly representable in f32; avoids
    # any unsigned->float conversion questions by going through int32).
    u = (h >> jnp.uint32(8)).astype(jnp.int32).astype(jnp.float32)
    u = u * jnp.float32(1.0 / (1 << 24))

    o_ref[...] = jnp.where(u < keep_ref[0],
                           jnp.float32(1.0),
                           jnp.float32(0.0)).astype(o_ref.dtype)


# ---------------------------- wrapper ----------------------------

def random_mask_forward(x, dropout_rate, seed=0):
    """Pallas equivalent of RandomMaskGenerator.forward(x)."""
    shape = tuple(x.shape)
    total = int(math.prod(shape)) if len(shape) else 1

    rows = max(pl.cdiv(total, LANE), 1)
    rows_pad = _round_up(rows, SUBLANE)

    if rows_pad <= MAX_BLOCK_ROWS:
        block_rows = rows_pad
    else:
        block_rows = MAX_BLOCK_ROWS
        rows_pad = _round_up(rows_pad, block_rows)
    grid = (rows_pad // block_rows,)

    seed_arr = jnp.asarray([seed], jnp.int32)
    keep_prob = jnp.asarray([1.0 - float(dropout_rate)], jnp.float32)

    mask2d = pl.pallas_call(
        _bernoulli_mask_kernel,
        out_shape=jax.ShapeDtypeStruct((rows_pad, LANE), jnp.float32),
        grid=grid,
        in_specs=[
            pl.BlockSpec(memory_space=pltpu.MemorySpace.SMEM),  # seed
            pl.BlockSpec(memory_space=pltpu.MemorySpace.SMEM),  # keep prob
        ],
        out_specs=pl.BlockSpec((block_rows, LANE), lambda i: (i, 0)),
        compiler_params=pltpu.CompilerParams(
            dimension_semantics=("parallel",)),
    )(seed_arr, keep_prob)

    return mask2d.reshape(-1)[:total].reshape(shape)


# ---------------------------- demo / self-check ----------------------------

if __name__ == "__main__":
    key = jax.random.PRNGKey(0)
    x = jax.random.normal(key, (2, 4, 16, 16), dtype=jnp.float32)
    dropout_rate = 0.3

    mask = random_mask_forward(x, dropout_rate, seed=0)
    mask = jax.block_until_ready(mask)

    # Shape / dtype match the module's output.
    assert mask.shape == x.shape, mask.shape
    assert mask.dtype == jnp.float32, mask.dtype
    # Mask values are exactly {0, 1}.
    assert bool(jnp.all((mask == 0.0) | (mask == 1.0)))
    # Deterministic for a fixed seed.
    mask2 = jax.block_until_ready(random_mask_forward(x, dropout_rate, seed=0))
    assert bool(jnp.all(mask == mask2))
    # Different seed -> different draw (overwhelmingly likely for 2048 elems).
    mask3 = jax.block_until_ready(random_mask_forward(x, dropout_rate, seed=1))
    assert not bool(jnp.all(mask == mask3))
    # Empirical keep rate ~ (1 - dropout_rate): 2048 i.i.d. draws, sigma ~ 0.010.
    emp = float(jnp.mean(mask))
    assert abs(emp - (1.0 - dropout_rate)) < 0.08, emp

    print("KERNEL_OK")
</pallas_src>

<mosaic_0001>
module attributes {stable_mosaic.version = 11 : i64} {
  func.func @_bernoulli_mask_kernel(%arg0: i32, %arg1: memref<1xi32, #tpu.memory_space<smem>>, %arg2: memref<1xf32, #tpu.memory_space<smem>>, %arg3: memref<16x128xf32, #tpu.memory_space<vmem>>) attributes {dimension_semantics = [#tpu.dimension_semantics<parallel>], iteration_bounds = array<i64: 1>, scalar_prefetch = 0 : i64, scratch_operands = 0 : i64, tpu.core_type = #tpu.core_type<tc>, window_params = [{transform_indices = @transform_0, window_bounds = array<i64: 1>}, {transform_indices = @transform_1, window_bounds = array<i64: 1>}, {transform_indices = @transform_2, window_bounds = array<i64: 16, 128>}]} {
    %0 = tpu.iota {dimensions = array<i32: 0>} : vector<16x128xi32>
    %1 = tpu.iota {dimensions = array<i32: 1>} : vector<16x128xi32>
    %c16_i32 = arith.constant 16 : i32
    %2 = arith.muli %arg0, %c16_i32 : i32
    %3 = vector.broadcast %2 : i32 to vector<16x128xi32>
    %4 = arith.addi %3, %0 : vector<16x128xi32>
    %c128_i32 = arith.constant 128 : i32
    %5 = vector.broadcast %c128_i32 : i32 to vector<16x128xi32>
    %6 = arith.muli %4, %5 : vector<16x128xi32>
    %7 = arith.addi %6, %1 : vector<16x128xi32>
    %c0 = arith.constant 0 : index
    %8 = memref.load %arg1[%c0] : memref<1xi32, #tpu.memory_space<smem>>
    %c-1640531527_i32 = arith.constant -1640531527 : i32
    %9 = arith.muli %8, %c-1640531527_i32 : i32
    %10 = vector.broadcast %9 : i32 to vector<16x128xi32>
    %11 = arith.addi %7, %10 : vector<16x128xi32>
    %c16_i32_0 = arith.constant 16 : i32
    %12 = vector.broadcast %c16_i32_0 : i32 to vector<16x128xi32>
    %13 = arith.shrui %11, %12 : vector<16x128xi32>
    %14 = arith.xori %11, %13 : vector<16x128xi32>
    %c2146121005_i32 = arith.constant 2146121005 : i32
    %15 = vector.broadcast %c2146121005_i32 : i32 to vector<16x128xi32>
    %16 = arith.muli %14, %15 : vector<16x128xi32>
    %c15_i32 = arith.constant 15 : i32
    %17 = vector.broadcast %c15_i32 : i32 to vector<16x128xi32>
    %18 = arith.shrui %16, %17 : vector<16x128xi32>
    %19 = arith.xori %16, %18 : vector<16x128xi32>
    %c-2073254261_i32 = arith.constant -2073254261 : i32
    %20 = vector.broadcast %c-2073254261_i32 : i32 to vector<16x128xi32>
    %21 = arith.muli %19, %20 : vector<16x128xi32>
    %c16_i32_1 = arith.constant 16 : i32
    %22 = vector.broadcast %c16_i32_1 : i32 to vector<16x128xi32>
    %23 = arith.shrui %21, %22 : vector<16x128xi32>
    %24 = arith.xori %21, %23 : vector<16x128xi32>
    %c8_i32 = arith.constant 8 : i32
    %25 = vector.broadcast %c8_i32 : i32 to vector<16x128xi32>
    %26 = arith.shrui %24, %25 : vector<16x128xi32>
    %27 = arith.sitofp %26 : vector<16x128xi32> to vector<16x128xf32>
    %cst = arith.constant 5.96046448E-8 : f32
    %28 = vector.broadcast %cst : f32 to vector<16x128xf32>
    %29 = arith.mulf %27, %28 : vector<16x128xf32>
    %c0_2 = arith.constant 0 : index
    %30 = memref.load %arg2[%c0_2] : memref<1xf32, #tpu.memory_space<smem>>
    %31 = vector.broadcast %30 : f32 to vector<16x128xf32>
    %32 = arith.cmpf olt, %29, %31 : vector<16x128xf32>
    %cst_3 = arith.constant 1.000000e+00 : f32
    %cst_4 = arith.constant 0.000000e+00 : f32
    %33 = vector.broadcast %cst_3 : f32 to vector<16x128xf32>
    %34 = vector.broadcast %cst_4 : f32 to vector<16x128xf32>
    %35 = arith.select %32, %33, %34 : vector<16x128xi1>, vector<16x128xf32>
    %c0_5 = arith.constant 0 : index
    %c0_6 = arith.constant 0 : index
    %36 = vector.load %arg3[%c0_5, %c0_6] : memref<16x128xf32, #tpu.memory_space<vmem>>, vector<16x128xf32>
    tpu.vector_store %arg3[%c0_5, %c0_6], %35 {strides = array<i32>} : memref<16x128xf32, #tpu.memory_space<vmem>>, vector<16x128xf32>,
    return
  }
  func.func @transform_0(%arg0: i32) -> i32 {
    %c0_i32 = arith.constant 0 : i32
    %c0_i32_0 = arith.constant 0 : i32
    return %c0_i32 : i32
  }
  func.func @transform_1(%arg0: i32) -> i32 {
    %c0_i32 = arith.constant 0 : i32
    %c0_i32_0 = arith.constant 0 : i32
    return %c0_i32 : i32
  }
  func.func @transform_2(%arg0: i32) -> (i32, i32) {
    %c0_i32 = arith.constant 0 : i32
    %c0_i32_0 = arith.constant 0 : i32
    return %arg0, %c0_i32 : i32, i32
  }
}

</mosaic_0001>

<bundles_post_ra>
// kernel: tpu_custom_call.1
= control target key start
LH: loop header
LB: loop body
LE: loop exit
PB: predicated region body
PF: predicated region fallthrough
CT: control target
= control target key end

     0   :  { %v14_v0 = vlaneseq  ;;  %s132_s0 = inlined_call_operand.<no memory space> [shape: s32[1], index: 0, kind: input, shape index: {}]   ;;  %s133_s1 = inlined_call_operand.<no memory space> [shape: f32[1], index: 1, kind: input, shape index: {}]   ;;  %s134_s2 = inlined_call_operand.hbm [shape: f32[16,128], index: 2, kind: output, shape index: {}]  }
   0x1   :  { %9 = vsyncpa [#allocation5], 0  ;;  %s28_s11 = smul.u32 2654435769, %s132_s0  ;;  %v55_v30 = vstv %s133_s1  ;;  %s104_s13 = smov [#allocation4]   ;;  %v105_v34 = vmov 0.0  }
   0x2   :  { %v15_v1 = vshrl.u32 %v14_v0, 7  ;;  %v18_v2 = vand.u32 127, %v14_v0  ;;  %s67_s14 = sshll.u32 %s104_s13, 4  ;;  %s68_s14 = int_to_ptr.vmem [resolvable:$true] %s67_s14 }
   0x3   :  { %v29_v5 = vstv %s28_s11  ;;  %s82_s15 = scalar_lea.vmem %s68_s14, 256  ;;  %p87_p1 = scmp.lt.s32.totalorder %s68_s14, %s68_s14 }
   0x4   :  { %v23_v3 = vmul.u32 128, %v15_v1  ;;  %v16_v4 = vadd.s32 8, %v15_v1  ;;  %p83_p0 = scmp.ne.s32.totalorder %s68_s14, %s82_s15  ;;  %p88_p2 = scmp.lt.s32.totalorder %s82_s15, %s82_s15 }
   0x6   :  { %v25_v6 = vadd.s32 %v23_v3, %v18_v2  ;;  %v24_v7 = vmul.u32 128, %v16_v4  ;;  %p89_p3 = por %p88_p2, %p87_p1 }
   0x8   :  { %v30_v8 = vadd.s32 %v29_v5, %v25_v6  ;;  %v26_v9 = vadd.s32 %v24_v7, %v18_v2  ;;  %p90_p4 = pnand %p89_p3, %p83_p0 }
   0xa   :  { %v32_v10 = vshrl.u32 %v30_v8, 16  ;;  %v31_v11 = vadd.s32 %v29_v5, %v26_v9 }
   0xc   :  { %v34_v12 = vxor.u32 %v32_v10, %v30_v8  ;;  %v33_v13 = vshrl.u32 %v31_v11, 16 }
   0xe   :  { %v36_v14 = vmul.u32 2146121005, %v34_v12  ;;  %v35_v15 = vxor.u32 %v33_v13, %v31_v11 }
  0x10   :  { %v38_v16 = vshrl.u32 %v36_v14, 15  ;;  %v37_v17 = vmul.u32 2146121005, %v35_v15 }
  0x12   :  { %v40_v18 = vxor.u32 %v38_v16, %v36_v14  ;;  %v39_v19 = vshrl.u32 %v37_v17, 15 }
  0x14   :  { %v42_v20 = vmul.u32 2221713035, %v40_v18  ;;  %v41_v21 = vxor.u32 %v39_v19, %v37_v17 }
  0x16   :  { %v44_v22 = vshrl.u32 %v42_v20, 16  ;;  %v43_v23 = vmul.u32 2221713035, %v41_v21 }
  0x18   :  { %v46_v24 = vxor.u32 %v44_v22, %v42_v20  ;;  %v45_v25 = vshrl.u32 %v43_v23, 16 }
  0x1a   :  { %v48_v26 = vshrl.u32 %v46_v24, 8  ;;  %v47_v27 = vxor.u32 %v45_v25, %v43_v23 }
  0x1c   :  { %v50_v28 = vcvt.s32.f32 %v48_v26  ;;  %v49_v29 = vshrl.u32 %v47_v27, 8 }
  0x1e   :  { %v52_v31 = vmul.f32 5.9604645e-08, %v50_v28  ;;  %v51_v32 = vcvt.s32.f32 %v49_v29 }
  0x20   :  { %vm56_vm0 = vcmp.lt.f32.partialorder %v52_v31, %v55_v30  ;;  %v53_v33 = vmul.f32 5.9604645e-08, %v51_v32 }
  0x21   :  { %v58_v35 = vsel %vm56_vm0, 1.0, %v105_v34 }
  0x22   :  { %60 = vst [vmem:[#allocation4] sm:$0xff] %v58_v35  ;;  %vm57_vm1 = vcmp.lt.f32.partialorder %v53_v33, %v55_v30 }
  0x23   :  { %v59_v36 = vsel %vm57_vm1, 1.0, %v105_v34 }
  0x24   :  { %61 = vst [vmem:[#allocation4 + $0x8] sm:$0xff] %v59_v36 }
  0x25   :  { %93 = shalt.err (!%p90_p4)
}
  0x26   :  { %s106_s1 = smov 128   ;;  %s107_s16 = smov 8  }
  0x27   :  { %73 = dma.vmem_to_hbm [thread:$0]  %s68_s14, 256, %s134_s2, [#allocation5], %s106_s1, %s106_s1, %s107_s16  }
  0x28   :  { %102 = dma.done.wait [#allocation5], 256  }
  0x29   :  { %103 = vsyncadd [#allocation5], 4294967040 }
  0x2a   :  { %77 = vsyncpa [#allocation5], 1 }

</bundles_post_ra>
